<compile_context>
chip_gen: v5e
topology: v5e:2x2
jax: 0.10.0
libtpu: 0.0.40
codegen_flags: <defaults>
</compile_context>

<pallas_src>
import jax
import jax.numpy as jnp
from jax.experimental import pallas as pl
from jax.experimental.pallas import tpu as pltpu


def _round_up(x, m):
    return ((x + m - 1) // m) * m


def resnet_block_kernel(x_ref, w_ref, b_ref, o_ref):
    """Fused: o = relu(x @ W + b) + x  (W pre-transposed to (D_in, D_out), bf16)."""
    x = x_ref[...]                                         # (tm, D) f32
    y = jnp.dot(x.astype(w_ref.dtype), w_ref[...],
                preferred_element_type=jnp.float32)        # bf16 MXU, f32 accumulate
    y = jnp.maximum(y + b_ref[...], 0.0)                   # bias + ReLU in f32
    o_ref[...] = (y + x).astype(o_ref.dtype)               # residual add with f32 x


def prepare_params(w, b):
    """One-time param prep: PyTorch (out, in) Linear weight -> (in, out) bf16."""
    w_t = jnp.asarray(w, jnp.float32).T.astype(jnp.bfloat16)   # (D_in, D_out)
    b2 = jnp.asarray(b, jnp.float32).reshape(1, -1)            # (1, D_out) f32
    return w_t, b2


def _make_call(M, D, tm, x_dtype, w_dtype, *, single_buffer_resident):
    grid_m = pl.cdiv(M, tm)

    resident_kwargs = (
        dict(pipeline_mode=pl.Buffered(1)) if single_buffer_resident else {}
    )

    # VMEM plan: x/out tiles double-buffered, weight/bias resident.
    isz_x = jnp.dtype(x_dtype).itemsize
    isz_w = jnp.dtype(w_dtype).itemsize
    w_bufs = 1 if single_buffer_resident else 2
    vmem_plan = (2 * tm * D * isz_x            # x tiles (double-buffered)
                 + 2 * tm * D * isz_x          # out tiles (double-buffered)
                 + w_bufs * D * D * isz_w      # weight
                 + w_bufs * D * 4)             # bias
    vmem_limit = min(max(int(vmem_plan * 1.25) + (1 << 20), 2 << 20), 64 << 20)

    cost = pl.CostEstimate(
        flops=2 * M * D * D,
        transcendentals=0,
        bytes_accessed=2 * M * D * isz_x + D * D * isz_w + D * 4,
    )

    return pl.pallas_call(
        resnet_block_kernel,
        out_shape=jax.ShapeDtypeStruct((M, D), x_dtype),
        grid_spec=pltpu.PrefetchScalarGridSpec(
            num_scalar_prefetch=0,
            grid=(grid_m,),
            in_specs=[
                pl.BlockSpec((tm, D), lambda i: (i, 0)),                    # x tile
                pl.BlockSpec((D, D), lambda i: (0, 0), **resident_kwargs),  # weight
                pl.BlockSpec((1, D), lambda i: (0, 0), **resident_kwargs),  # bias
            ],
            out_specs=pl.BlockSpec((tm, D), lambda i: (i, 0)),
        ),
        compiler_params=pltpu.CompilerParams(
            dimension_semantics=("parallel",),
            vmem_limit_bytes=vmem_limit,
        ),
        cost_estimate=cost,
    )


def resnet_forward(x, w_t, b2, *, tm=256):
    """x: (M, D) f32; w_t: (D_in, D_out) bf16 (from prepare_params); b2: (1, D) f32."""
    M, D = x.shape
    # Large, MXU-filling row tile; multiple of 8; never bigger than needed.
    tm = min(tm, _round_up(M, 8))
    # Keep >= 2 parallel grid steps when there is enough work (v7x: 2 TensorCores).
    if pl.cdiv(M, tm) == 1 and M >= 256:
        tm = _round_up(pl.cdiv(M, 2), 8)
    # TODO(synk): for very large D (weight >> VMEM) add N/K grid axes with an f32
    # VMEM accumulator + pl.when init/finalize instead of a fully-resident weight.
    try:
        call = _make_call(M, D, tm, x.dtype, w_t.dtype, single_buffer_resident=True)
        return call(x, w_t, b2)
    except Exception:
        # Fallback for JAX versions without pipeline_mode support on pallas_call
        # block specs: default double-buffering for the resident weight/bias.
        call = _make_call(M, D, tm, x.dtype, w_t.dtype, single_buffer_resident=False)
        return call(x, w_t, b2)


def resnet_reference(x, w, b):
    """Plain-JAX f32 reference of the PyTorch forward: relu(Linear(x)) + x."""
    return jnp.maximum(x @ w.T + b, 0.0) + x


if __name__ == "__main__":
    key = jax.random.PRNGKey(0)
    kx, kw, kb = jax.random.split(key, 3)

    batch, hidden = 16, 128      # small, TPU-tile-aligned shapes
    x = jax.random.normal(kx, (batch, hidden), dtype=jnp.float32)
    # Deterministic "Linear(hidden, hidden)" parameters (PyTorch layout: (out, in)).
    bound = 1.0 / (hidden ** 0.5)
    w = jax.random.uniform(kw, (hidden, hidden), dtype=jnp.float32,
                           minval=-bound, maxval=bound)
    b = jax.random.uniform(kb, (hidden,), dtype=jnp.float32,
                           minval=-bound, maxval=bound)

    w_t, b2 = prepare_params(w, b)           # one-time transpose + bf16 cast
    out = jax.block_until_ready(resnet_forward(x, w_t, b2))

    ref_f32 = resnet_reference(x, w, b)
    # bf16-matched reference (same operand precision, f32 accumulation).
    ref_bf16 = jnp.maximum(
        jnp.dot(x.astype(jnp.bfloat16), w_t,
                preferred_element_type=jnp.float32) + b2, 0.0) + x

    assert out.shape == ref_f32.shape and out.dtype == ref_f32.dtype
    assert jnp.max(jnp.abs(out - ref_bf16)) < 1e-3   # kernel matches bf16-operand math
    assert jnp.max(jnp.abs(out - ref_f32)) < 5e-2    # close to full-f32 reference

    print("KERNEL_OK")
</pallas_src>

<mosaic_0001>
module attributes {stable_mosaic.version = 11 : i64} {
  func.func @resnet_block_kernel(%arg0: i32, %arg1: memref<16x128xf32, #tpu.memory_space<vmem>>, %arg2: memref<128x128xbf16, #tpu.memory_space<vmem>>, %arg3: memref<1x128xf32, #tpu.memory_space<vmem>>, %arg4: memref<16x128xf32, #tpu.memory_space<vmem>>) attributes {dimension_semantics = [#tpu.dimension_semantics<parallel>], iteration_bounds = array<i64: 1>, scalar_prefetch = 0 : i64, scratch_operands = 0 : i64, tpu.core_type = #tpu.core_type<tc>, window_params = [{transform_indices = @transform_0, window_bounds = array<i64: 16, 128>}, {pipeline_mode = #tpu.pipeline_mode<synchronous>, transform_indices = @transform_1, window_bounds = array<i64: 128, 128>}, {pipeline_mode = #tpu.pipeline_mode<synchronous>, transform_indices = @transform_2, window_bounds = array<i64: 1, 128>}, {transform_indices = @transform_3, window_bounds = array<i64: 16, 128>}]} {
    %c0 = arith.constant 0 : index
    %c0_0 = arith.constant 0 : index
    %0 = vector.load %arg1[%c0, %c0_0] : memref<16x128xf32, #tpu.memory_space<vmem>>, vector<16x128xf32>
    %1 = arith.truncf %0 : vector<16x128xf32> to vector<16x128xbf16>
    %c0_1 = arith.constant 0 : index
    %c0_2 = arith.constant 0 : index
    %2 = vector.load %arg2[%c0_1, %c0_2] : memref<128x128xbf16, #tpu.memory_space<vmem>>, vector<128x128xbf16>
    %cst = arith.constant dense<0.000000e+00> : vector<16x128xf32>
    %3 = tpu.matmul %1, %2, %cst {dimension_numbers = #tpu.dot_dimension_numbers<[1], [0], [0], [1], [0, 0, 1, 1], [], []>} : vector<16x128xbf16>, vector<128x128xbf16>, vector<16x128xf32> -> vector<16x128xf32>
    %c0_3 = arith.constant 0 : index
    %c0_4 = arith.constant 0 : index
    %4 = vector.load %arg3[%c0_3, %c0_4] : memref<1x128xf32, #tpu.memory_space<vmem>>, vector<1x128xf32>
    %5 = vector.broadcast %4 : vector<1x128xf32> to vector<16x128xf32>
    %6 = arith.addf %3, %5 : vector<16x128xf32>
    %cst_5 = arith.constant 0.000000e+00 : f32
    %7 = vector.broadcast %cst_5 : f32 to vector<16x128xf32>
    %8 = arith.maximumf %6, %7 : vector<16x128xf32>
    %9 = arith.addf %8, %0 : vector<16x128xf32>
    %c0_6 = arith.constant 0 : index
    %c0_7 = arith.constant 0 : index
    %10 = vector.load %arg4[%c0_6, %c0_7] : memref<16x128xf32, #tpu.memory_space<vmem>>, vector<16x128xf32>
    tpu.vector_store %arg4[%c0_6, %c0_7], %9 {strides = array<i32>} : memref<16x128xf32, #tpu.memory_space<vmem>>, vector<16x128xf32>,
    return
  }
  func.func @transform_0(%arg0: i32) -> (i32, i32) {
    %c0_i32 = arith.constant 0 : i32
    %c0_i32_0 = arith.constant 0 : i32
    return %arg0, %c0_i32 : i32, i32
  }
  func.func @transform_1(%arg0: i32) -> (i32, i32) {
    %c0_i32 = arith.constant 0 : i32
    %c0_i32_0 = arith.constant 0 : i32
    %c0_i32_1 = arith.constant 0 : i32
    return %c0_i32, %c0_i32_0 : i32, i32
  }
  func.func @transform_2(%arg0: i32) -> (i32, i32) {
    %c0_i32 = arith.constant 0 : i32
    %c0_i32_0 = arith.constant 0 : i32
    %c0_i32_1 = arith.constant 0 : i32
    return %c0_i32, %c0_i32_0 : i32, i32
  }
  func.func @transform_3(%arg0: i32) -> (i32, i32) {
    %c0_i32 = arith.constant 0 : i32
    %c0_i32_0 = arith.constant 0 : i32
    return %arg0, %c0_i32 : i32, i32
  }
}

module attributes {stable_mosaic.version = 11 : i64} {
  func.func @resnet_block_kernel(%arg0: i32, %arg1: memref<16x128xf32, #tpu.memory_space<vmem>>, %arg2: memref<128x128xbf16, #tpu.memory_space<vmem>>, %arg3: memref<1x128xf32, #tpu.memory_space<vmem>>, %arg4: memref<16x128xf32, #tpu.memory_space<vmem>>) attributes {dimension_semantics = [#tpu.dimension_semantics<parallel>], iteration_bounds = array<i64: 1>, scalar_prefetch = 0 : i64, scratch_operands = 0 : i64, tpu.core_type = #tpu.core_type<tc>, window_params = [{transform_indices = @transform_0, window_bounds = array<i64: 16, 128>}, {pipeline_mode = #tpu.pipeline_mode<synchronous>, transform_indices = @transform_1, window_bounds = array<i64: 128, 128>}, {pipeline_mode = #tpu.pipeline_mode<synchronous>, transform_indices = @transform_2, window_bounds = array<i64: 1, 128>}, {transform_indices = @transform_3, window_bounds = array<i64: 16, 128>}]} {
    %c0 = arith.constant 0 : index
    %c0_0 = arith.constant 0 : index
    %0 = vector.load %arg1[%c0, %c0_0] : memref<16x128xf32, #tpu.memory_space<vmem>>, vector<16x128xf32>
    %1 = arith.truncf %0 : vector<16x128xf32> to vector<16x128xbf16>
    %c0_1 = arith.constant 0 : index
    %c0_2 = arith.constant 0 : index
    %2 = vector.load %arg2[%c0_1, %c0_2] : memref<128x128xbf16, #tpu.memory_space<vmem>>, vector<128x128xbf16>
    %cst = arith.constant dense<0.000000e+00> : vector<16x128xf32>
    %3 = tpu.matmul %1, %2, %cst {dimension_numbers = #tpu.dot_dimension_numbers<[1], [0], [0], [1], [0, 0, 1, 1], [], []>} : vector<16x128xbf16>, vector<128x128xbf16>, vector<16x128xf32> -> vector<16x128xf32>
    %c0_3 = arith.constant 0 : index
    %c0_4 = arith.constant 0 : index
    %4 = vector.load %arg3[%c0_3, %c0_4] : memref<1x128xf32, #tpu.memory_space<vmem>>, vector<1x128xf32>
    %5 = vector.broadcast %4 : vector<1x128xf32> to vector<16x128xf32>
    %6 = arith.addf %3, %5 : vector<16x128xf32>
    %cst_5 = arith.constant 0.000000e+00 : f32
    %7 = vector.broadcast %cst_5 : f32 to vector<16x128xf32>
    %8 = arith.maximumf %6, %7 : vector<16x128xf32>
    %9 = arith.addf %8, %0 : vector<16x128xf32>
    %c0_6 = arith.constant 0 : index
    %c0_7 = arith.constant 0 : index
    %10 = vector.load %arg4[%c0_6, %c0_7] : memref<16x128xf32, #tpu.memory_space<vmem>>, vector<16x128xf32>
    tpu.vector_store %arg4[%c0_6, %c0_7], %9 {strides = array<i32>} : memref<16x128xf32, #tpu.memory_space<vmem>>, vector<16x128xf32>,
    return
  }
  func.func @transform_0(%arg0: i32) -> (i32, i32) {
    %c0_i32 = arith.constant 0 : i32
    %c0_i32_0 = arith.constant 0 : i32
    return %arg0, %c0_i32 : i32, i32
  }
  func.func @transform_1(%arg0: i32) -> (i32, i32) {
    %c0_i32 = arith.constant 0 : i32
    %c0_i32_0 = arith.constant 0 : i32
    %c0_i32_1 = arith.constant 0 : i32
    return %c0_i32, %c0_i32_0 : i32, i32
  }
  func.func @transform_2(%arg0: i32) -> (i32, i32) {
    %c0_i32 = arith.constant 0 : i32
    %c0_i32_0 = arith.constant 0 : i32
    %c0_i32_1 = arith.constant 0 : i32
    return %c0_i32, %c0_i32_0 : i32, i32
  }
  func.func @transform_3(%arg0: i32) -> (i32, i32) {
    %c0_i32 = arith.constant 0 : i32
    %c0_i32_0 = arith.constant 0 : i32
    return %arg0, %c0_i32 : i32, i32
  }
}

</mosaic_0001>

<bundles_post_ra>
// kernel: tpu_custom_call.1
= control target key start
LH: loop header
LB: loop body
LE: loop exit
PB: predicated region body
PF: predicated region fallthrough
CT: control target
= control target key end

     0   :  { %8 = vsyncpa [#allocation3], 0  ;;  %s329_s0 = inlined_call_operand.hbm [shape: f32[16,128], index: 0, kind: input, shape index: {}]   ;;  %s330_s1 = inlined_call_operand.hbm [shape: bf16[128,128], index: 1, kind: input, shape index: {}]   ;;  %s331_s2 = inlined_call_operand.vmem [shape: f32[1,128], index: 2, kind: input, shape index: {}]   ;;  %s332_s3 = inlined_call_operand.hbm [shape: f32[16,128], index: 3, kind: output, shape index: {}]  }
   0x1   :  { %9 = vsyncpa [#allocation6], 0 }
   0x2   :  { %10 = vsyncpa [#allocation4], 0  ;;  %s15_s14 = sshll.u32 %s329_s0, 4  ;;  %s284_s15 = smov [#allocation2]   ;;  %s16_s14 = int_to_ptr.hbm [resolvable:$true] %s15_s14 }
   0x3   :  { %s17_s16 = sshll.u32 %s284_s15, 4  ;;  %s28_s19 = sshll.u32 %s330_s1, 4  ;;  %s18_s16 = int_to_ptr.vmem [resolvable:$true] %s17_s16  ;;  %s29_s19 = int_to_ptr.hbm [resolvable:$true] %s28_s19 }
   0x4   :  { %s285_s20 = smov 128   ;;  %s286_s21 = smov 8  }
   0x5   :  { %23 = dma.hbm_to_vmem [thread:$0]  %s16_s14, 256, %s18_s16, [#allocation3], %s285_s20, %s285_s20, %s286_s21  }
   0x6   :  { %s287_s22 = smov [#allocation5]   ;;  %s288_s24 = smov 64  }
   0x7   :  { %s30_s23 = sshll.u32 %s287_s22, 4  ;;  %s289_s0 = smov 4   ;;  %s31_s23 = int_to_ptr.vmem [resolvable:$true] %s30_s23 }
   0x8   :  { %36 = dma.hbm_to_vmem [thread:$0]  %s29_s19, 1024, %s31_s23, [#allocation6], %s288_s24, %s288_s24, %s289_s0  }
   0x9   :  { %278 = dma.done.wait [#allocation3], 256  }
   0xa   :  { %279 = vsyncadd [#allocation3], 4294967040 }
   0xb   :  { %280 = dma.done.wait [#allocation6], 1024  }
   0xc   :  { %281 = vsyncadd [#allocation6], 4294966272  ;;  %v197_v0 = vld [vmem:[#allocation5 + $0x38] sm:$0xff]  ;;  %v196_v1 = vld [vmem:[#allocation5 + $0x30] sm:$0xff]  ;;  %s290_s26 = smov [#allocation7]   ;;  %s144_s30 = sshll.u32 %s332_s3, 4  ;;  %s145_s30 = int_to_ptr.hbm [resolvable:$true] %s144_s30 }
   0xd   :  { %118 = vmatpush.bf16.msra.mxu0 %v197_v0  ;;  %v195_v2 = vld [vmem:[#allocation5 + $0x28] sm:$0xff]  ;;  %v194_v3 = vld [vmem:[#allocation5 + $0x20] sm:$0xff]  ;;  %v193_v4 = vld [vmem:[#allocation5 + $0x18] sm:$0xff]  ;;  %s142_s27 = sshll.u32 %s290_s26, 4  ;;  %s143_s27 = int_to_ptr.vmem [resolvable:$true] %s142_s27 }
   0xe   :  { %v192_v5 = vld [vmem:[#allocation5 + $0x10] sm:$0xff]  ;;  %v191_v6 = vld [vmem:[#allocation5 + $0x8] sm:$0xff]  ;;  %v190_v7 = vld [vmem:[#allocation5] sm:$0xff] }
   0xf   :  { %v47_v8 = vld [vmem:[#allocation2] sm:$0xff]  ;;  %v48_v9 = vld [vmem:[#allocation2 + $0x8] sm:$0xff] }
  0x10   :  { %v49_v10 = vpack.c.bf16 %v48_v9, %v47_v8  ;;  %v205_v11 = vld [vmem:[%s331_s2] ss:$0 sm:$0xff] }
  0x11   :  { %119 = vmatpush.bf16.msra.mxu0 %v196_v1 }
  0x15   :  { %120 = vmatpush.bf16.msra.mxu0 %v195_v2 }
  0x19   :  { %121 = vmatpush.bf16.msra.mxu0 %v194_v3 }
  0x1d   :  { %122 = vmatpush.bf16.msra.mxu0 %v193_v4 }
  0x21   :  { %123 = vmatpush.bf16.msra.mxu0 %v192_v5 }
  0x25   :  { %124 = vmatpush.bf16.msra.mxu0 %v191_v6 }
  0x29   :  { %125 = vmatpush.bf16.msra.mxu0 %v190_v7 }
  0x2c   :  { %126 = vmatmul.bf16.vlgmr.msra.gmra.mxu0 %v49_v10 }
  0xa9   :  { %v127_v12 = vpop.f32.mrf.mxu0 }
  0xaa   :  { %v128_v13 = vadd.f32 %v205_v11, %v127_v12 }
  0xac   :  { %v132_v14 = vmax.f32 %v128_v13, 0.0 }
  0xae   :  { %v134_v15 = vadd.f32 %v132_v14, %v47_v8 }
  0xb0   :  { %136 = vst [vmem:[#allocation7] sm:$0xff] %v134_v15 }
  0xb1   :  { %v129_v16 = vpop.f32.mrf.mxu0 }
  0xb2   :  { %v130_v17 = vadd.f32 %v205_v11, %v129_v16 }
  0xb4   :  { %v133_v18 = vmax.f32 %v130_v17, 0.0 }
  0xb6   :  { %v135_v19 = vadd.f32 %v133_v18, %v48_v9 }
  0xb8   :  { %137 = vst [vmem:[#allocation7 + $0x8] sm:$0xff] %v135_v19 }
  0xb9   :  { %150 = dma.vmem_to_hbm [thread:$0]  %s143_s27, 256, %s145_s30, [#allocation4], %s285_s20, %s285_s20, %s286_s21  }
  0xba   :  { %282 = dma.done.wait [#allocation4], 256  }
  0xbb   :  { %283 = vsyncadd [#allocation4], 4294967040 }
  0xbc   :  { %155 = vsyncpa [#allocation3], 1 }
  0xbd   :  { %156 = vsyncpa [#allocation6], 1 }
  0xbe   :  { %157 = vsyncpa [#allocation4], 1 }

// kernel: tpu_custom_call.1
= control target key start
LH: loop header
LB: loop body
LE: loop exit
PB: predicated region body
PF: predicated region fallthrough
CT: control target
= control target key end

     0   :  { %8 = vsyncpa [#allocation3], 0  ;;  %s329_s0 = inlined_call_operand.hbm [shape: f32[16,128], index: 0, kind: input, shape index: {}]   ;;  %s330_s1 = inlined_call_operand.hbm [shape: bf16[128,128], index: 1, kind: input, shape index: {}]   ;;  %s331_s2 = inlined_call_operand.vmem [shape: f32[1,128], index: 2, kind: input, shape index: {}]   ;;  %s332_s3 = inlined_call_operand.hbm [shape: f32[16,128], index: 3, kind: output, shape index: {}]  }
   0x1   :  { %9 = vsyncpa [#allocation6], 0 }
   0x2   :  { %10 = vsyncpa [#allocation4], 0  ;;  %s15_s14 = sshll.u32 %s329_s0, 4  ;;  %s284_s15 = smov [#allocation2]   ;;  %s16_s14 = int_to_ptr.hbm [resolvable:$true] %s15_s14 }
   0x3   :  { %s17_s16 = sshll.u32 %s284_s15, 4  ;;  %s28_s19 = sshll.u32 %s330_s1, 4  ;;  %s18_s16 = int_to_ptr.vmem [resolvable:$true] %s17_s16  ;;  %s29_s19 = int_to_ptr.hbm [resolvable:$true] %s28_s19 }
   0x4   :  { %s285_s20 = smov 128   ;;  %s286_s21 = smov 8  }
   0x5   :  { %23 = dma.hbm_to_vmem [thread:$0]  %s16_s14, 256, %s18_s16, [#allocation3], %s285_s20, %s285_s20, %s286_s21  }
   0x6   :  { %s287_s22 = smov [#allocation5]   ;;  %s288_s24 = smov 64  }
   0x7   :  { %s30_s23 = sshll.u32 %s287_s22, 4  ;;  %s289_s0 = smov 4   ;;  %s31_s23 = int_to_ptr.vmem [resolvable:$true] %s30_s23 }
   0x8   :  { %36 = dma.hbm_to_vmem [thread:$0]  %s29_s19, 1024, %s31_s23, [#allocation6], %s288_s24, %s288_s24, %s289_s0  }
   0x9   :  { %278 = dma.done.wait [#allocation3], 256  }
   0xa   :  { %279 = vsyncadd [#allocation3], 4294967040 }
   0xb   :  { %280 = dma.done.wait [#allocation6], 1024  }
   0xc   :  { %281 = vsyncadd [#allocation6], 4294966272  ;;  %v197_v0 = vld [vmem:[#allocation5 + $0x38] sm:$0xff]  ;;  %v196_v1 = vld [vmem:[#allocation5 + $0x30] sm:$0xff]  ;;  %s290_s26 = smov [#allocation7]   ;;  %s144_s30 = sshll.u32 %s332_s3, 4  ;;  %s145_s30 = int_to_ptr.hbm [resolvable:$true] %s144_s30 }
   0xd   :  { %118 = vmatpush.bf16.msra.mxu0 %v197_v0  ;;  %v195_v2 = vld [vmem:[#allocation5 + $0x28] sm:$0xff]  ;;  %v194_v3 = vld [vmem:[#allocation5 + $0x20] sm:$0xff]  ;;  %v193_v4 = vld [vmem:[#allocation5 + $0x18] sm:$0xff]  ;;  %s142_s27 = sshll.u32 %s290_s26, 4  ;;  %s143_s27 = int_to_ptr.vmem [resolvable:$true] %s142_s27 }
   0xe   :  { %v192_v5 = vld [vmem:[#allocation5 + $0x10] sm:$0xff]  ;;  %v191_v6 = vld [vmem:[#allocation5 + $0x8] sm:$0xff]  ;;  %v190_v7 = vld [vmem:[#allocation5] sm:$0xff] }
   0xf   :  { %v47_v8 = vld [vmem:[#allocation2] sm:$0xff]  ;;  %v48_v9 = vld [vmem:[#allocation2 + $0x8] sm:$0xff] }
  0x10   :  { %v49_v10 = vpack.c.bf16 %v48_v9, %v47_v8  ;;  %v205_v11 = vld [vmem:[%s331_s2] ss:$0 sm:$0xff] }
  0x11   :  { %119 = vmatpush.bf16.msra.mxu0 %v196_v1 }
  0x15   :  { %120 = vmatpush.bf16.msra.mxu0 %v195_v2 }
  0x19   :  { %121 = vmatpush.bf16.msra.mxu0 %v194_v3 }
  0x1d   :  { %122 = vmatpush.bf16.msra.mxu0 %v193_v4 }
  0x21   :  { %123 = vmatpush.bf16.msra.mxu0 %v192_v5 }
  0x25   :  { %124 = vmatpush.bf16.msra.mxu0 %v191_v6 }
  0x29   :  { %125 = vmatpush.bf16.msra.mxu0 %v190_v7 }
  0x2c   :  { %126 = vmatmul.bf16.vlgmr.msra.gmra.mxu0 %v49_v10 }
  0xa9   :  { %v127_v12 = vpop.f32.mrf.mxu0 }
  0xaa   :  { %v128_v13 = vadd.f32 %v205_v11, %v127_v12 }
  0xac   :  { %v132_v14 = vmax.f32 %v128_v13, 0.0 }
  0xae   :  { %v134_v15 = vadd.f32 %v132_v14, %v47_v8 }
  0xb0   :  { %136 = vst [vmem:[#allocation7] sm:$0xff] %v134_v15 }
  0xb1   :  { %v129_v16 = vpop.f32.mrf.mxu0 }
  0xb2   :  { %v130_v17 = vadd.f32 %v205_v11, %v129_v16 }
  0xb4   :  { %v133_v18 = vmax.f32 %v130_v17, 0.0 }
  0xb6   :  { %v135_v19 = vadd.f32 %v133_v18, %v48_v9 }
  0xb8   :  { %137 = vst [vmem:[#allocation7 + $0x8] sm:$0xff] %v135_v19 }
  0xb9   :  { %150 = dma.vmem_to_hbm [thread:$0]  %s143_s27, 256, %s145_s30, [#allocation4], %s285_s20, %s285_s20, %s286_s21  }
  0xba   :  { %282 = dma.done.wait [#allocation4], 256  }
  0xbb   :  { %283 = vsyncadd [#allocation4], 4294967040 }
  0xbc   :  { %155 = vsyncpa [#allocation3], 1 }
  0xbd   :  { %156 = vsyncpa [#allocation6], 1 }
  0xbe   :  { %157 = vsyncpa [#allocation4], 1 }

</bundles_post_ra>
